<compile_context>
chip_gen: v5e
topology: v5e:2x2
jax: 0.10.0
libtpu: 0.0.40
codegen_flags: <defaults>
</compile_context>

<pallas_src>
import jax
import jax.numpy as jnp
from jax import lax
from jax.experimental import pallas as pl
from jax.experimental.pallas import tpu as pltpu


def _round_up(x, m):
    return (x + m - 1) // m * m


def _tpu_kind():
    try:
        return jax.devices()[0].device_kind.lower()
    except Exception:
        return ""


def _vmem_capacity_bytes():
    try:
        return int(pltpu.get_tpu_info().vmem_capacity_bytes)
    except Exception:
        return 128 * 1024 * 1024  # v5e/v6e physical VMEM


def nbow_kernel(ids_ref, emb_ref, w_ref, b_ref, out_ref, pooled_ref):
    """Grid: (batch tiles [parallel], vocab tiles [arbitrary/reduction]).

    ids_ref    : VMEM (TB, S)  int32  batch tile of token ids
    emb_ref    : VMEM (TV, Dp) bf16   vocab chunk of the embedding table
    w_ref      : VMEM (Dp, Op) bf16   FC weight, pre-scaled by 1/S
    b_ref      : VMEM (1, Op)  f32    FC bias
    out_ref    : VMEM (TB, Op) f32    logits (written at the last vocab step)
    pooled_ref : VMEM (TB, Dp) f32    scratch accumulator (sum of embeddings)
    """
    TB, S = ids_ref.shape
    TV = emb_ref.shape[0]
    k = pl.program_id(1)

    @pl.when(k == 0)
    def _init():
        pooled_ref[...] = jnp.zeros_like(pooled_ref)

    ids = ids_ref[...]                                             # (TB, S) int32
    # (1, TV) iota for this vocab chunk; broadcast happens inside the compare.
    vocab_iota = lax.broadcasted_iota(jnp.int32, (1, TV), 1) + k * TV

    # Token-count matrix for this vocab chunk. S is small & static -> unrolled.
    # Accumulate in int32; one cast at the end (counts <= S, exact in bf16).
    counts = jnp.zeros((TB, TV), jnp.int32)
    for s in range(S):
        counts = counts + (ids[:, s:s + 1] == vocab_iota).astype(jnp.int32)

    # Gather + pool == counts @ table chunk (bf16 MXU, f32 accumulate).
    pooled_ref[...] += jnp.dot(
        counts.astype(jnp.bfloat16), emb_ref[...],
        preferred_element_type=jnp.float32)

    @pl.when(k == pl.num_programs(1) - 1)
    def _finalize():
        # FC layer; 1/S mean scale already folded into w_ref in the wrapper.
        pooled = pooled_ref[...].astype(jnp.bfloat16)
        out_ref[...] = (
            jnp.dot(pooled, w_ref[...], preferred_element_type=jnp.float32)
            + b_ref[...]
        )


def nbow_forward(ids, emb_table, fc_w, fc_b, *, batch_tile=None, vocab_tile=512):
    """ids: (B,S) int; emb_table: (V,D) f32; fc_w: (D,O) f32; fc_b: (O,) f32."""
    B, S = ids.shape
    V, D = emb_table.shape
    O = fc_w.shape[1]

    # Clamp ids: the in-kernel one-hot compare has no runtime OOB protection.
    ids = jnp.clip(ids.astype(jnp.int32), 0, V - 1)

    kind = _tpu_kind()
    if batch_tile is None:
        # v6e/v7x MXU is 256-row -> TB=256; v5e (and older) 128-row -> TB=128.
        batch_tile = 256 if ("v6" in kind or "v7" in kind or "7x" in kind) else 128

    # Lane/sublane-friendly padded sizes.
    Dp = _round_up(D, 128)                       # feature dim (300 -> 384)
    Op = _round_up(O, 128)                       # lane-dense output (4 -> 128)
    Vp0 = _round_up(V, 128)
    TV = min(Vp0, _round_up(vocab_tile, 128))    # vocab chunk per grid step
    Vp = _round_up(Vp0, TV)
    TB = min(_round_up(B, 8), batch_tile)        # batch tile (sublane mult of 8)
    Bp = _round_up(B, TB)

    # bf16 storage for MXU operands; fold the 1/S mean scale into the FC weight.
    inv_s = 1.0 / float(S)
    emb_p = jnp.zeros((Vp, Dp), jnp.bfloat16).at[:V, :D].set(
        emb_table.astype(jnp.bfloat16))
    w_p = jnp.zeros((Dp, Op), jnp.bfloat16).at[:D, :O].set(
        (fc_w * inv_s).astype(jnp.bfloat16))
    b_p = jnp.zeros((1, Op), jnp.float32).at[0, :O].set(fc_b.astype(jnp.float32))
    ids_p = jnp.zeros((Bp, S), jnp.int32).at[:B].set(ids)

    # VMEM budget: double-buffered table chunk / ids / out, weights, bias,
    # pooled scratch. Cap at ~3/4 of device VMEM (96 MiB v5e/v6e, 48 MiB v7x).
    needed = (2 * TV * Dp * 2                  # emb chunk (bf16, 2 buffers)
              + 2 * Dp * Op * 2                # fc weight (worst case 2 buffers)
              + 2 * 8 * Op * 4                 # bias (sublane-padded)
              + 2 * TB * max(S, 128) * 4       # ids (lane-padded)
              + 2 * TB * Op * 4                # out
              + TB * Dp * 4)                   # pooled scratch
    vmem_cap = (_vmem_capacity_bytes() * 3) // 4
    vmem_limit = int(min(vmem_cap, max(16 << 20, 2 * needed)))

    grid = (Bp // TB, Vp // TV)

    def run(single_buffer_consts):
        # FC weight/bias index_map is (0,0) for every step -> single buffering
        # halves their footprint (double-buffering a constant buys nothing).
        const_kw = {"pipeline_mode": pl.Buffered(1)} if single_buffer_consts else {}
        return pl.pallas_call(
            nbow_kernel,
            out_shape=jax.ShapeDtypeStruct((Bp, Op), jnp.float32),
            grid_spec=pltpu.PrefetchScalarGridSpec(
                num_scalar_prefetch=0,
                grid=grid,
                in_specs=[
                    pl.BlockSpec((TB, S), lambda i, k: (i, 0)),     # ids
                    pl.BlockSpec((TV, Dp), lambda i, k: (k, 0)),    # table chunk
                    pl.BlockSpec((Dp, Op), lambda i, k: (0, 0), **const_kw),
                    pl.BlockSpec((1, Op), lambda i, k: (0, 0), **const_kw),
                ],
                out_specs=pl.BlockSpec((TB, Op), lambda i, k: (i, 0)),
                scratch_shapes=[pltpu.VMEM((TB, Dp), jnp.float32)],
            ),
            compiler_params=pltpu.CompilerParams(
                dimension_semantics=("parallel", "arbitrary"),
                vmem_limit_bytes=vmem_limit,
            ),
        )(ids_p, emb_p, w_p, b_p)

    try:
        out = run(True)
    except Exception:
        # pl.Buffered(1) unsupported on this jax version -> default buffering.
        out = run(False)

    return out[:B, :O]


if __name__ == "__main__":
    # Small, deterministic synthetic config consistent with the module.
    vocab_size = 50
    embedding_dim = 300   # module value; exercises the D -> 384 padding path
    output_dim = 4
    pad_index = 1
    batch, seq = 8, 8

    key = jax.random.PRNGKey(0)
    k_emb, k_w, k_b, k_ids = jax.random.split(key, 4)

    # nn.Embedding default init ~ N(0,1); padding_idx row is zeroed.
    emb_table = jax.random.normal(k_emb, (vocab_size, embedding_dim), jnp.float32)
    emb_table = emb_table.at[pad_index].set(0.0)

    # nn.Linear default init ~ U(-1/sqrt(D), 1/sqrt(D)); stored (D, O) so the
    # kernel computes pooled @ W + b (equivalent to torch's x @ W.T + b).
    bound = 1.0 / (embedding_dim ** 0.5)
    fc_w = jax.random.uniform(k_w, (embedding_dim, output_dim), jnp.float32,
                              minval=-bound, maxval=bound)
    fc_b = jax.random.uniform(k_b, (output_dim,), jnp.float32,
                              minval=-bound, maxval=bound)

    ids = jax.random.randint(k_ids, (batch, seq), 0, vocab_size, dtype=jnp.int32)
    ids = ids.at[:, -2:].set(pad_index)   # sprinkle in padding tokens

    out = nbow_forward(ids, emb_table, fc_w, fc_b)
    out = jax.block_until_ready(out)

    # Pure-JAX f32 reference (embedding -> mean -> linear). The kernel runs the
    # MXU in bf16 (table/weights rounded), so tolerance is relaxed to ~1e-2.
    ref = jnp.take(emb_table, ids, axis=0).mean(axis=1) @ fc_w + fc_b
    assert out.shape == (batch, output_dim)
    max_err = float(jnp.max(jnp.abs(out - ref)))
    assert jnp.allclose(out, ref, atol=2e-2, rtol=2e-2), max_err

    print("KERNEL_OK")
</pallas_src>

<mosaic_0001>
module attributes {stable_mosaic.version = 11 : i64} {
  func.func @nbow_kernel(%arg0: i32, %arg1: i32, %arg2: memref<8x8xi32, #tpu.memory_space<vmem>>, %arg3: memref<128x384xbf16, #tpu.memory_space<vmem>>, %arg4: memref<384x128xbf16, #tpu.memory_space<vmem>>, %arg5: memref<1x128xf32, #tpu.memory_space<vmem>>, %arg6: memref<8x128xf32, #tpu.memory_space<vmem>>, %arg7: memref<8x384xf32, #tpu.memory_space<vmem>>) attributes {dimension_semantics = [#tpu.dimension_semantics<parallel>, #tpu.dimension_semantics<arbitrary>], iteration_bounds = array<i64: 1, 1>, scalar_prefetch = 0 : i64, scratch_operands = 1 : i64, tpu.core_type = #tpu.core_type<tc>, window_params = [{transform_indices = @transform_0, window_bounds = array<i64: 8, 8>}, {transform_indices = @transform_1, window_bounds = array<i64: 128, 384>}, {pipeline_mode = #tpu.pipeline_mode<synchronous>, transform_indices = @transform_2, window_bounds = array<i64: 384, 128>}, {pipeline_mode = #tpu.pipeline_mode<synchronous>, transform_indices = @transform_3, window_bounds = array<i64: 1, 128>}, {transform_indices = @transform_4, window_bounds = array<i64: 8, 128>}]} {
    %c0_i32 = arith.constant 0 : i32
    %0 = arith.cmpi eq, %arg1, %c0_i32 : i32
    %1 = arith.extui %0 : i1 to i32
    %c0_i32_0 = arith.constant 0 : i32
    %2 = arith.cmpi ne, %1, %c0_i32_0 : i32
    scf.if %2 {
      %cst_11 = arith.constant 0.000000e+00 : f32
      %66 = vector.broadcast %cst_11 : f32 to vector<8x384xf32>
      %c0_12 = arith.constant 0 : index
      %c0_13 = arith.constant 0 : index
      %67 = vector.load %arg7[%c0_12, %c0_13] : memref<8x384xf32, #tpu.memory_space<vmem>>, vector<8x384xf32>
      tpu.vector_store %arg7[%c0_12, %c0_13], %66 {strides = array<i32>} : memref<8x384xf32, #tpu.memory_space<vmem>>, vector<8x384xf32>,
    } else {
    }
    %c0 = arith.constant 0 : index
    %c0_1 = arith.constant 0 : index
    %3 = vector.load %arg2[%c0, %c0_1] : memref<8x8xi32, #tpu.memory_space<vmem>>, vector<8x8xi32>
    %4 = tpu.iota {dimensions = array<i32: 1>} : vector<1x128xi32>
    %c128_i32 = arith.constant 128 : i32
    %5 = arith.muli %arg1, %c128_i32 : i32
    %6 = vector.broadcast %5 : i32 to vector<1x128xi32>
    %7 = arith.addi %4, %6 : vector<1x128xi32>
    %c0_i32_2 = arith.constant 0 : i32
    %8 = vector.broadcast %c0_i32_2 : i32 to vector<8x128xi32>
    %9 = vector.extract_strided_slice %3 {offsets = [0, 0], sizes = [8, 1], strides = [1, 1]} : vector<8x8xi32> to vector<8x1xi32>
    %10 = vector.broadcast %9 : vector<8x1xi32> to vector<8x128xi32>
    %11 = vector.broadcast %7 : vector<1x128xi32> to vector<8x128xi32>
    %12 = arith.cmpi eq, %10, %11 : vector<8x128xi32>
    %13 = arith.extui %12 : vector<8x128xi1> to vector<8x128xi32>
    %14 = arith.addi %8, %13 : vector<8x128xi32>
    %15 = vector.extract_strided_slice %3 {offsets = [0, 1], sizes = [8, 1], strides = [1, 1]} : vector<8x8xi32> to vector<8x1xi32>
    %16 = vector.broadcast %15 : vector<8x1xi32> to vector<8x128xi32>
    %17 = vector.broadcast %7 : vector<1x128xi32> to vector<8x128xi32>
    %18 = arith.cmpi eq, %16, %17 : vector<8x128xi32>
    %19 = arith.extui %18 : vector<8x128xi1> to vector<8x128xi32>
    %20 = arith.addi %14, %19 : vector<8x128xi32>
    %21 = vector.extract_strided_slice %3 {offsets = [0, 2], sizes = [8, 1], strides = [1, 1]} : vector<8x8xi32> to vector<8x1xi32>
    %22 = vector.broadcast %21 : vector<8x1xi32> to vector<8x128xi32>
    %23 = vector.broadcast %7 : vector<1x128xi32> to vector<8x128xi32>
    %24 = arith.cmpi eq, %22, %23 : vector<8x128xi32>
    %25 = arith.extui %24 : vector<8x128xi1> to vector<8x128xi32>
    %26 = arith.addi %20, %25 : vector<8x128xi32>
    %27 = vector.extract_strided_slice %3 {offsets = [0, 3], sizes = [8, 1], strides = [1, 1]} : vector<8x8xi32> to vector<8x1xi32>
    %28 = vector.broadcast %27 : vector<8x1xi32> to vector<8x128xi32>
    %29 = vector.broadcast %7 : vector<1x128xi32> to vector<8x128xi32>
    %30 = arith.cmpi eq, %28, %29 : vector<8x128xi32>
    %31 = arith.extui %30 : vector<8x128xi1> to vector<8x128xi32>
    %32 = arith.addi %26, %31 : vector<8x128xi32>
    %33 = vector.extract_strided_slice %3 {offsets = [0, 4], sizes = [8, 1], strides = [1, 1]} : vector<8x8xi32> to vector<8x1xi32>
    %34 = vector.broadcast %33 : vector<8x1xi32> to vector<8x128xi32>
    %35 = vector.broadcast %7 : vector<1x128xi32> to vector<8x128xi32>
    %36 = arith.cmpi eq, %34, %35 : vector<8x128xi32>
    %37 = arith.extui %36 : vector<8x128xi1> to vector<8x128xi32>
    %38 = arith.addi %32, %37 : vector<8x128xi32>
    %39 = vector.extract_strided_slice %3 {offsets = [0, 5], sizes = [8, 1], strides = [1, 1]} : vector<8x8xi32> to vector<8x1xi32>
    %40 = vector.broadcast %39 : vector<8x1xi32> to vector<8x128xi32>
    %41 = vector.broadcast %7 : vector<1x128xi32> to vector<8x128xi32>
    %42 = arith.cmpi eq, %40, %41 : vector<8x128xi32>
    %43 = arith.extui %42 : vector<8x128xi1> to vector<8x128xi32>
    %44 = arith.addi %38, %43 : vector<8x128xi32>
    %45 = vector.extract_strided_slice %3 {offsets = [0, 6], sizes = [8, 1], strides = [1, 1]} : vector<8x8xi32> to vector<8x1xi32>
    %46 = vector.broadcast %45 : vector<8x1xi32> to vector<8x128xi32>
    %47 = vector.broadcast %7 : vector<1x128xi32> to vector<8x128xi32>
    %48 = arith.cmpi eq, %46, %47 : vector<8x128xi32>
    %49 = arith.extui %48 : vector<8x128xi1> to vector<8x128xi32>
    %50 = arith.addi %44, %49 : vector<8x128xi32>
    %51 = vector.extract_strided_slice %3 {offsets = [0, 7], sizes = [8, 1], strides = [1, 1]} : vector<8x8xi32> to vector<8x1xi32>
    %52 = vector.broadcast %51 : vector<8x1xi32> to vector<8x128xi32>
    %53 = vector.broadcast %7 : vector<1x128xi32> to vector<8x128xi32>
    %54 = arith.cmpi eq, %52, %53 : vector<8x128xi32>
    %55 = arith.extui %54 : vector<8x128xi1> to vector<8x128xi32>
    %56 = arith.addi %50, %55 : vector<8x128xi32>
    %c0_3 = arith.constant 0 : index
    %c0_4 = arith.constant 0 : index
    %57 = vector.load %arg7[%c0_3, %c0_4] : memref<8x384xf32, #tpu.memory_space<vmem>>, vector<8x384xf32>
    %58 = arith.sitofp %56 : vector<8x128xi32> to vector<8x128xbf16>
    %c0_5 = arith.constant 0 : index
    %c0_6 = arith.constant 0 : index
    %59 = vector.load %arg3[%c0_5, %c0_6] : memref<128x384xbf16, #tpu.memory_space<vmem>>, vector<128x384xbf16>
    %cst = arith.constant dense<0.000000e+00> : vector<8x384xf32>
    %60 = tpu.matmul %58, %59, %cst {dimension_numbers = #tpu.dot_dimension_numbers<[1], [0], [0], [1], [0, 0, 1, 1], [], []>} : vector<8x128xbf16>, vector<128x384xbf16>, vector<8x384xf32> -> vector<8x384xf32>
    %61 = arith.addf %57, %60 : vector<8x384xf32>
    %c0_7 = arith.constant 0 : index
    %c0_8 = arith.constant 0 : index
    %62 = vector.load %arg7[%c0_7, %c0_8] : memref<8x384xf32, #tpu.memory_space<vmem>>, vector<8x384xf32>
    tpu.vector_store %arg7[%c0_7, %c0_8], %61 {strides = array<i32>} : memref<8x384xf32, #tpu.memory_space<vmem>>, vector<8x384xf32>,
    %c0_i32_9 = arith.constant 0 : i32
    %63 = arith.cmpi eq, %arg1, %c0_i32_9 : i32
    %64 = arith.extui %63 : i1 to i32
    %c0_i32_10 = arith.constant 0 : i32
    %65 = arith.cmpi ne, %64, %c0_i32_10 : i32
    scf.if %65 {
      %c0_11 = arith.constant 0 : index
      %c0_12 = arith.constant 0 : index
      %66 = vector.load %arg7[%c0_11, %c0_12] : memref<8x384xf32, #tpu.memory_space<vmem>>, vector<8x384xf32>
      %67 = arith.truncf %66 : vector<8x384xf32> to vector<8x384xbf16>
      %c0_13 = arith.constant 0 : index
      %c0_14 = arith.constant 0 : index
      %68 = vector.load %arg4[%c0_13, %c0_14] : memref<384x128xbf16, #tpu.memory_space<vmem>>, vector<384x128xbf16>
      %cst_15 = arith.constant dense<0.000000e+00> : vector<8x128xf32>
      %69 = tpu.matmul %67, %68, %cst_15 {dimension_numbers = #tpu.dot_dimension_numbers<[1], [0], [0], [1], [0, 0, 1, 1], [], []>} : vector<8x384xbf16>, vector<384x128xbf16>, vector<8x128xf32> -> vector<8x128xf32>
      %c0_16 = arith.constant 0 : index
      %c0_17 = arith.constant 0 : index
      %70 = vector.load %arg5[%c0_16, %c0_17] : memref<1x128xf32, #tpu.memory_space<vmem>>, vector<1x128xf32>
      %71 = vector.broadcast %70 : vector<1x128xf32> to vector<8x128xf32>
      %72 = arith.addf %69, %71 : vector<8x128xf32>
      %c0_18 = arith.constant 0 : index
      %c0_19 = arith.constant 0 : index
      %73 = vector.load %arg6[%c0_18, %c0_19] : memref<8x128xf32, #tpu.memory_space<vmem>>, vector<8x128xf32>
      tpu.vector_store %arg6[%c0_18, %c0_19], %72 {strides = array<i32>} : memref<8x128xf32, #tpu.memory_space<vmem>>, vector<8x128xf32>,
    } else {
    }
    return
  }
  func.func @transform_0(%arg0: i32, %arg1: i32) -> (i32, i32) {
    %c0_i32 = arith.constant 0 : i32
    %c0_i32_0 = arith.constant 0 : i32
    return %arg0, %c0_i32 : i32, i32
  }
  func.func @transform_1(%arg0: i32, %arg1: i32) -> (i32, i32) {
    %c0_i32 = arith.constant 0 : i32
    %c0_i32_0 = arith.constant 0 : i32
    return %arg1, %c0_i32 : i32, i32
  }
  func.func @transform_2(%arg0: i32, %arg1: i32) -> (i32, i32) {
    %c0_i32 = arith.constant 0 : i32
    %c0_i32_0 = arith.constant 0 : i32
    %c0_i32_1 = arith.constant 0 : i32
    return %c0_i32, %c0_i32_0 : i32, i32
  }
  func.func @transform_3(%arg0: i32, %arg1: i32) -> (i32, i32) {
    %c0_i32 = arith.constant 0 : i32
    %c0_i32_0 = arith.constant 0 : i32
    %c0_i32_1 = arith.constant 0 : i32
    return %c0_i32, %c0_i32_0 : i32, i32
  }
  func.func @transform_4(%arg0: i32, %arg1: i32) -> (i32, i32) {
    %c0_i32 = arith.constant 0 : i32
    %c0_i32_0 = arith.constant 0 : i32
    return %arg0, %c0_i32 : i32, i32
  }
}

module attributes {stable_mosaic.version = 11 : i64} {
  func.func @nbow_kernel(%arg0: i32, %arg1: i32, %arg2: memref<8x8xi32, #tpu.memory_space<vmem>>, %arg3: memref<128x384xbf16, #tpu.memory_space<vmem>>, %arg4: memref<384x128xbf16, #tpu.memory_space<vmem>>, %arg5: memref<1x128xf32, #tpu.memory_space<vmem>>, %arg6: memref<8x128xf32, #tpu.memory_space<vmem>>, %arg7: memref<8x384xf32, #tpu.memory_space<vmem>>) attributes {dimension_semantics = [#tpu.dimension_semantics<parallel>, #tpu.dimension_semantics<arbitrary>], iteration_bounds = array<i64: 1, 1>, scalar_prefetch = 0 : i64, scratch_operands = 1 : i64, tpu.core_type = #tpu.core_type<tc>, window_params = [{transform_indices = @transform_0, window_bounds = array<i64: 8, 8>}, {transform_indices = @transform_1, window_bounds = array<i64: 128, 384>}, {pipeline_mode = #tpu.pipeline_mode<synchronous>, transform_indices = @transform_2, window_bounds = array<i64: 384, 128>}, {pipeline_mode = #tpu.pipeline_mode<synchronous>, transform_indices = @transform_3, window_bounds = array<i64: 1, 128>}, {transform_indices = @transform_4, window_bounds = array<i64: 8, 128>}]} {
    %c0_i32 = arith.constant 0 : i32
    %0 = arith.cmpi eq, %arg1, %c0_i32 : i32
    %1 = arith.extui %0 : i1 to i32
    %c0_i32_0 = arith.constant 0 : i32
    %2 = arith.cmpi ne, %1, %c0_i32_0 : i32
    scf.if %2 {
      %cst_11 = arith.constant 0.000000e+00 : f32
      %66 = vector.broadcast %cst_11 : f32 to vector<8x384xf32>
      %c0_12 = arith.constant 0 : index
      %c0_13 = arith.constant 0 : index
      %67 = vector.load %arg7[%c0_12, %c0_13] : memref<8x384xf32, #tpu.memory_space<vmem>>, vector<8x384xf32>
      tpu.vector_store %arg7[%c0_12, %c0_13], %66 {strides = array<i32>} : memref<8x384xf32, #tpu.memory_space<vmem>>, vector<8x384xf32>,
    } else {
    }
    %c0 = arith.constant 0 : index
    %c0_1 = arith.constant 0 : index
    %3 = vector.load %arg2[%c0, %c0_1] : memref<8x8xi32, #tpu.memory_space<vmem>>, vector<8x8xi32>
    %4 = tpu.iota {dimensions = array<i32: 1>} : vector<1x128xi32>
    %c128_i32 = arith.constant 128 : i32
    %5 = arith.muli %arg1, %c128_i32 : i32
    %6 = vector.broadcast %5 : i32 to vector<1x128xi32>
    %7 = arith.addi %4, %6 : vector<1x128xi32>
    %c0_i32_2 = arith.constant 0 : i32
    %8 = vector.broadcast %c0_i32_2 : i32 to vector<8x128xi32>
    %9 = vector.extract_strided_slice %3 {offsets = [0, 0], sizes = [8, 1], strides = [1, 1]} : vector<8x8xi32> to vector<8x1xi32>
    %10 = vector.broadcast %9 : vector<8x1xi32> to vector<8x128xi32>
    %11 = vector.broadcast %7 : vector<1x128xi32> to vector<8x128xi32>
    %12 = arith.cmpi eq, %10, %11 : vector<8x128xi32>
    %13 = arith.extui %12 : vector<8x128xi1> to vector<8x128xi32>
    %14 = arith.addi %8, %13 : vector<8x128xi32>
    %15 = vector.extract_strided_slice %3 {offsets = [0, 1], sizes = [8, 1], strides = [1, 1]} : vector<8x8xi32> to vector<8x1xi32>
    %16 = vector.broadcast %15 : vector<8x1xi32> to vector<8x128xi32>
    %17 = vector.broadcast %7 : vector<1x128xi32> to vector<8x128xi32>
    %18 = arith.cmpi eq, %16, %17 : vector<8x128xi32>
    %19 = arith.extui %18 : vector<8x128xi1> to vector<8x128xi32>
    %20 = arith.addi %14, %19 : vector<8x128xi32>
    %21 = vector.extract_strided_slice %3 {offsets = [0, 2], sizes = [8, 1], strides = [1, 1]} : vector<8x8xi32> to vector<8x1xi32>
    %22 = vector.broadcast %21 : vector<8x1xi32> to vector<8x128xi32>
    %23 = vector.broadcast %7 : vector<1x128xi32> to vector<8x128xi32>
    %24 = arith.cmpi eq, %22, %23 : vector<8x128xi32>
    %25 = arith.extui %24 : vector<8x128xi1> to vector<8x128xi32>
    %26 = arith.addi %20, %25 : vector<8x128xi32>
    %27 = vector.extract_strided_slice %3 {offsets = [0, 3], sizes = [8, 1], strides = [1, 1]} : vector<8x8xi32> to vector<8x1xi32>
    %28 = vector.broadcast %27 : vector<8x1xi32> to vector<8x128xi32>
    %29 = vector.broadcast %7 : vector<1x128xi32> to vector<8x128xi32>
    %30 = arith.cmpi eq, %28, %29 : vector<8x128xi32>
    %31 = arith.extui %30 : vector<8x128xi1> to vector<8x128xi32>
    %32 = arith.addi %26, %31 : vector<8x128xi32>
    %33 = vector.extract_strided_slice %3 {offsets = [0, 4], sizes = [8, 1], strides = [1, 1]} : vector<8x8xi32> to vector<8x1xi32>
    %34 = vector.broadcast %33 : vector<8x1xi32> to vector<8x128xi32>
    %35 = vector.broadcast %7 : vector<1x128xi32> to vector<8x128xi32>
    %36 = arith.cmpi eq, %34, %35 : vector<8x128xi32>
    %37 = arith.extui %36 : vector<8x128xi1> to vector<8x128xi32>
    %38 = arith.addi %32, %37 : vector<8x128xi32>
    %39 = vector.extract_strided_slice %3 {offsets = [0, 5], sizes = [8, 1], strides = [1, 1]} : vector<8x8xi32> to vector<8x1xi32>
    %40 = vector.broadcast %39 : vector<8x1xi32> to vector<8x128xi32>
    %41 = vector.broadcast %7 : vector<1x128xi32> to vector<8x128xi32>
    %42 = arith.cmpi eq, %40, %41 : vector<8x128xi32>
    %43 = arith.extui %42 : vector<8x128xi1> to vector<8x128xi32>
    %44 = arith.addi %38, %43 : vector<8x128xi32>
    %45 = vector.extract_strided_slice %3 {offsets = [0, 6], sizes = [8, 1], strides = [1, 1]} : vector<8x8xi32> to vector<8x1xi32>
    %46 = vector.broadcast %45 : vector<8x1xi32> to vector<8x128xi32>
    %47 = vector.broadcast %7 : vector<1x128xi32> to vector<8x128xi32>
    %48 = arith.cmpi eq, %46, %47 : vector<8x128xi32>
    %49 = arith.extui %48 : vector<8x128xi1> to vector<8x128xi32>
    %50 = arith.addi %44, %49 : vector<8x128xi32>
    %51 = vector.extract_strided_slice %3 {offsets = [0, 7], sizes = [8, 1], strides = [1, 1]} : vector<8x8xi32> to vector<8x1xi32>
    %52 = vector.broadcast %51 : vector<8x1xi32> to vector<8x128xi32>
    %53 = vector.broadcast %7 : vector<1x128xi32> to vector<8x128xi32>
    %54 = arith.cmpi eq, %52, %53 : vector<8x128xi32>
    %55 = arith.extui %54 : vector<8x128xi1> to vector<8x128xi32>
    %56 = arith.addi %50, %55 : vector<8x128xi32>
    %c0_3 = arith.constant 0 : index
    %c0_4 = arith.constant 0 : index
    %57 = vector.load %arg7[%c0_3, %c0_4] : memref<8x384xf32, #tpu.memory_space<vmem>>, vector<8x384xf32>
    %58 = arith.sitofp %56 : vector<8x128xi32> to vector<8x128xbf16>
    %c0_5 = arith.constant 0 : index
    %c0_6 = arith.constant 0 : index
    %59 = vector.load %arg3[%c0_5, %c0_6] : memref<128x384xbf16, #tpu.memory_space<vmem>>, vector<128x384xbf16>
    %cst = arith.constant dense<0.000000e+00> : vector<8x384xf32>
    %60 = tpu.matmul %58, %59, %cst {dimension_numbers = #tpu.dot_dimension_numbers<[1], [0], [0], [1], [0, 0, 1, 1], [], []>} : vector<8x128xbf16>, vector<128x384xbf16>, vector<8x384xf32> -> vector<8x384xf32>
    %61 = arith.addf %57, %60 : vector<8x384xf32>
    %c0_7 = arith.constant 0 : index
    %c0_8 = arith.constant 0 : index
    %62 = vector.load %arg7[%c0_7, %c0_8] : memref<8x384xf32, #tpu.memory_space<vmem>>, vector<8x384xf32>
    tpu.vector_store %arg7[%c0_7, %c0_8], %61 {strides = array<i32>} : memref<8x384xf32, #tpu.memory_space<vmem>>, vector<8x384xf32>,
    %c0_i32_9 = arith.constant 0 : i32
    %63 = arith.cmpi eq, %arg1, %c0_i32_9 : i32
    %64 = arith.extui %63 : i1 to i32
    %c0_i32_10 = arith.constant 0 : i32
    %65 = arith.cmpi ne, %64, %c0_i32_10 : i32
    scf.if %65 {
      %c0_11 = arith.constant 0 : index
      %c0_12 = arith.constant 0 : index
      %66 = vector.load %arg7[%c0_11, %c0_12] : memref<8x384xf32, #tpu.memory_space<vmem>>, vector<8x384xf32>
      %67 = arith.truncf %66 : vector<8x384xf32> to vector<8x384xbf16>
      %c0_13 = arith.constant 0 : index
      %c0_14 = arith.constant 0 : index
      %68 = vector.load %arg4[%c0_13, %c0_14] : memref<384x128xbf16, #tpu.memory_space<vmem>>, vector<384x128xbf16>
      %cst_15 = arith.constant dense<0.000000e+00> : vector<8x128xf32>
      %69 = tpu.matmul %67, %68, %cst_15 {dimension_numbers = #tpu.dot_dimension_numbers<[1], [0], [0], [1], [0, 0, 1, 1], [], []>} : vector<8x384xbf16>, vector<384x128xbf16>, vector<8x128xf32> -> vector<8x128xf32>
      %c0_16 = arith.constant 0 : index
      %c0_17 = arith.constant 0 : index
      %70 = vector.load %arg5[%c0_16, %c0_17] : memref<1x128xf32, #tpu.memory_space<vmem>>, vector<1x128xf32>
      %71 = vector.broadcast %70 : vector<1x128xf32> to vector<8x128xf32>
      %72 = arith.addf %69, %71 : vector<8x128xf32>
      %c0_18 = arith.constant 0 : index
      %c0_19 = arith.constant 0 : index
      %73 = vector.load %arg6[%c0_18, %c0_19] : memref<8x128xf32, #tpu.memory_space<vmem>>, vector<8x128xf32>
      tpu.vector_store %arg6[%c0_18, %c0_19], %72 {strides = array<i32>} : memref<8x128xf32, #tpu.memory_space<vmem>>, vector<8x128xf32>,
    } else {
    }
    return
  }
  func.func @transform_0(%arg0: i32, %arg1: i32) -> (i32, i32) {
    %c0_i32 = arith.constant 0 : i32
    %c0_i32_0 = arith.constant 0 : i32
    return %arg0, %c0_i32 : i32, i32
  }
  func.func @transform_1(%arg0: i32, %arg1: i32) -> (i32, i32) {
    %c0_i32 = arith.constant 0 : i32
    %c0_i32_0 = arith.constant 0 : i32
    return %arg1, %c0_i32 : i32, i32
  }
  func.func @transform_2(%arg0: i32, %arg1: i32) -> (i32, i32) {
    %c0_i32 = arith.constant 0 : i32
    %c0_i32_0 = arith.constant 0 : i32
    %c0_i32_1 = arith.constant 0 : i32
    return %c0_i32, %c0_i32_0 : i32, i32
  }
  func.func @transform_3(%arg0: i32, %arg1: i32) -> (i32, i32) {
    %c0_i32 = arith.constant 0 : i32
    %c0_i32_0 = arith.constant 0 : i32
    %c0_i32_1 = arith.constant 0 : i32
    return %c0_i32, %c0_i32_0 : i32, i32
  }
  func.func @transform_4(%arg0: i32, %arg1: i32) -> (i32, i32) {
    %c0_i32 = arith.constant 0 : i32
    %c0_i32_0 = arith.constant 0 : i32
    return %arg0, %c0_i32 : i32, i32
  }
}

</mosaic_0001>

<bundles_post_ra>
// kernel: tpu_custom_call.1
= control target key start
LH: loop header
LB: loop body
LE: loop exit
PB: predicated region body
PF: predicated region fallthrough
CT: control target
= control target key end

     0   :  { %9 = vsyncpa [#allocation4], 0  ;;  %s1029_s0 = inlined_call_operand.hbm [shape: s32[8,8], index: 0, kind: input, shape index: {}]   ;;  %s1030_s1 = inlined_call_operand.hbm [shape: bf16[128,384], index: 1, kind: input, shape index: {}]   ;;  %s1031_s2 = inlined_call_operand.hbm [shape: bf16[384,128], index: 2, kind: input, shape index: {}]   ;;  %s1032_s3 = inlined_call_operand.vmem [shape: f32[1,128], index: 3, kind: input, shape index: {}]   ;;  %s1033_s4 = inlined_call_operand.hbm [shape: f32[8,128], index: 4, kind: output, shape index: {}]  }
   0x1   :  { %10 = vsyncpa [#allocation7], 0  ;;  %s27_s17 = sshll.u32 %s1030_s1, 4  ;;  %s28_s17 = int_to_ptr.hbm [resolvable:$true] %s27_s17 }
   0x2   :  { %11 = vsyncpa [#allocation5], 0  ;;  %s964_s18 = smov [#allocation6]   ;;  %s17_s22 = sshll.u32 %s1029_s0, 4  ;;  %s18_s22 = int_to_ptr.hbm [resolvable:$true] %s17_s22 }
   0x3   :  { %s29_s19 = sshll.u32 %s964_s18, 4  ;;  %s965_s23 = smov 192   ;;  %s30_s19 = int_to_ptr.vmem [resolvable:$true] %s29_s19 }
   0x4   :  { %s966_s24 = smov 12   ;;  %s967_s25 = smov [#allocation3]  }
   0x5   :  { %35 = dma.hbm_to_vmem [thread:$0]  %s28_s17, 3072, %s30_s19, [#allocation7], %s965_s23, %s965_s23, %s966_s24  }
   0x6   :  { %s19_s26 = sshll.u32 %s967_s25, 4  ;;  %s40_s29 = sshll.u32 %s1031_s2, 4  ;;  %s20_s26 = int_to_ptr.vmem [resolvable:$true] %s19_s26  ;;  %s41_s29 = int_to_ptr.hbm [resolvable:$true] %s40_s29 }
   0x7   :  { %22 = dma.hbm_to_vmem [thread:$0]  %s18_s22, 128, %s20_s26, [#allocation4]  }
   0x8   :  { %s968_s1 = smov [#allocation8]   ;;  %s969_s5 = smov 64  }
   0x9   :  { %s42_s30 = sshll.u32 %s968_s1, 4  ;;  %s970_s6 = smov 4   ;;  %s43_s30 = int_to_ptr.vmem [resolvable:$true] %s42_s30 }
   0xa   :  { %48 = dma.hbm_to_vmem [thread:$0]  %s41_s29, 3072, %s43_s30, [#allocation7], %s969_s5, %s969_s5, %s970_s6  }
   0xb   :  { %958 = dma.done.wait [#allocation4], 128  }
   0xc   :  { %959 = vsyncadd [#allocation4], 4294967168 }
   0xd   :  { %960 = dma.done.wait [#allocation7], 6144  }
   0xe   :  { %961 = vsyncadd [#allocation7], 4294961152  ;;  %v971_v0 = vmov 0   ;;  %v972_v1 = vmov 2   ;;  %v973_v2 = vmov 4   ;;  %v70_v3 = vld [vmem:[#allocation3] sm:$0xff] }
   0xf   :  { %852 = vset.pattern.permute.xlu0 %v971_v0  ;;  %854 = vset.pattern.permute.xlu1 %v972_v1  ;;  %v682_v4 = vld [vmem:[#allocation6 + $0xa8] sm:$0xf]  ;;  %v810_v5 = vld [vmem:[#allocation6 + $0xb0] sm:$0xf0]  ;;  %v809_v7 = vld [vmem:[#allocation6 + $0xac] sm:$0xf] }
  0x10   :  { %856 = vset.pattern.permute.xlu2 %v973_v2  ;;  %77 = vperm.xlu0 %852, %v70_v3   ;;  %v683_v6 = vor.u32 %v810_v5, %v682_v4  ;;  %v684_v8 = vld [vmem:[#allocation6 + $0xb4] sm:$0xf0]  ;;  %v690_v9 = vld [vmem:[#allocation6 + $0xb0] sm:$0xf]  ;;  %v811_v11 = vld [vmem:[#allocation6 + $0xb8] sm:$0xf0] }
  0x11   :  { %88 = vperm.xlu1 %854, %v70_v3   ;;  %100 = vperm.xlu2 %856, %v70_v3   ;;  %v687_v10 = vor.u32 %v809_v7, %v684_v8  ;;  %v691_v12 = vor.u32 %v811_v11, %v690_v9  ;;  %v974_v13 = vmov 1   ;;  %v975_v14 = vmov 3   ;;  %v670_v18 = vld [vmem:[#allocation6 + $0x90] sm:$0xf]  ;;  %v807_v19 = vld [vmem:[#allocation6 + $0x98] sm:$0xf0] }
  0x12   :  { %288 = vmatpush.bf16.msra.mxu0 %v683_v6  ;;  %v976_v15 = vmov 5   ;;  %v977_v16 = vmov 6   ;;  %v978_v17 = vmov 7   ;;  %v806_v20 = vld [vmem:[#allocation6 + $0x94] sm:$0xf]  ;;  %v671_v21 = vor.u32 %v807_v19, %v670_v18  ;;  %v819_v19 = vld [vmem:[#allocation8 + $0x38] sm:$0xff] }
  0x13   :  { %301 = vmatpush.bf16.msra.mxu1 %v687_v10  ;;  %314 = vmatpush.bf16.msra.mxu2 %v691_v12  ;;  %v672_v22 = vld [vmem:[#allocation6 + $0x9c] sm:$0xf0]  ;;  %v678_v23 = vld [vmem:[#allocation6 + $0x98] sm:$0xf]  ;;  %v808_v24 = vld [vmem:[#allocation6 + $0xa0] sm:$0xf0] }
  0x14   :  { %v675_v25 = vor.u32 %v806_v20, %v672_v22  ;;  %v679_v26 = vor.u32 %v808_v24, %v678_v23  ;;  %v658_v27 = vld [vmem:[#allocation6 + $0x78] sm:$0xf]  ;;  %v804_v28 = vld [vmem:[#allocation6 + $0x80] sm:$0xf0]  ;;  %v803_v29 = vld [vmem:[#allocation6 + $0x7c] sm:$0xf]  ;;  %538 = vmatpush.bf16.msra.mxu3 %v819_v19 }
  0x15   :  { %v659_v30 = vor.u32 %v804_v28, %v658_v27  ;;  %v660_v31 = vld [vmem:[#allocation6 + $0x84] sm:$0xf0]  ;;  %v666_v32 = vld [vmem:[#allocation6 + $0x80] sm:$0xf]  ;;  %v805_v33 = vld [vmem:[#allocation6 + $0x88] sm:$0xf0] }
  0x16   :  { %289 = vmatpush.bf16.msra.mxu0 %v671_v21  ;;  %v663_v34 = vor.u32 %v803_v29, %v660_v31  ;;  %v667_v35 = vor.u32 %v805_v33, %v666_v32  ;;  %v646_v36 = vld [vmem:[#allocation6 + $0x60] sm:$0xf]  ;;  %v801_v37 = vld [vmem:[#allocation6 + $0x68] sm:$0xf0]  ;;  %v800_v38 = vld [vmem:[#allocation6 + $0x64] sm:$0xf]  ;;  %v71_v21 = vlaneseq }
  0x17   :  { %302 = vmatpush.bf16.msra.mxu1 %v675_v25  ;;  %315 = vmatpush.bf16.msra.mxu2 %v679_v26  ;;  %v647_v39 = vor.u32 %v801_v37, %v646_v36  ;;  %v648_v40 = vld [vmem:[#allocation6 + $0x6c] sm:$0xf0]  ;;  %v654_v41 = vld [vmem:[#allocation6 + $0x68] sm:$0xf]  ;;  %v802_v42 = vld [vmem:[#allocation6 + $0x70] sm:$0xf0] }
  0x18   :  { %853 = vset.pattern.permute.xlu0 %v974_v13  ;;  %v651_v43 = vor.u32 %v800_v38, %v648_v40  ;;  %v655_v44 = vor.u32 %v802_v42, %v654_v41  ;;  %v634_v45 = vld [vmem:[#allocation6 + $0x48] sm:$0xf]  ;;  %v798_v46 = vld [vmem:[#allocation6 + $0x50] sm:$0xf0]  ;;  %v797_v47 = vld [vmem:[#allocation6 + $0x4c] sm:$0xf] }
  0x19   :  { %855 = vset.pattern.permute.xlu1 %v975_v14  ;;  %82 = vperm.xlu0 %853, %v70_v3   ;;  %v635_v48 = vor.u32 %v798_v46, %v634_v45  ;;  %v636_v49 = vld [vmem:[#allocation6 + $0x54] sm:$0xf0]  ;;  %v642_v50 = vld [vmem:[#allocation6 + $0x50] sm:$0xf]  ;;  %v799_v51 = vld [vmem:[#allocation6 + $0x58] sm:$0xf0] }
  0x1a   :  { %94 = vperm.xlu1 %855, %v70_v3   ;;  %857 = vset.pattern.permute.xlu2 %v976_v15  ;;  %v639_v52 = vor.u32 %v797_v47, %v636_v49  ;;  %v643_v53 = vor.u32 %v799_v51, %v642_v50  ;;  %v622_v54 = vld [vmem:[#allocation6 + $0x30] sm:$0xf]  ;;  %v795_v55 = vld [vmem:[#allocation6 + $0x38] sm:$0xf0]  ;;  %v794_v56 = vld [vmem:[#allocation6 + $0x34] sm:$0xf] }
  0x1b   :  { %106 = vperm.xlu2 %857, %v70_v3   ;;  %290 = vmatpush.bf16.msra.mxu0 %v659_v30  ;;  %v623_v57 = vor.u32 %v795_v55, %v622_v54  ;;  %v624_v58 = vld [vmem:[#allocation6 + $0x3c] sm:$0xf0]  ;;  %v630_v59 = vld [vmem:[#allocation6 + $0x38] sm:$0xf]  ;;  %v796_v60 = vld [vmem:[#allocation6 + $0x40] sm:$0xf0] }
  0x1c   :  { %303 = vmatpush.bf16.msra.mxu1 %v663_v34  ;;  %316 = vmatpush.bf16.msra.mxu2 %v667_v35  ;;  %v627_v61 = vor.u32 %v794_v56, %v624_v58  ;;  %v631_v62 = vor.u32 %v796_v60, %v630_v59  ;;  %v610_v63 = vld [vmem:[#allocation6 + $0x18] sm:$0xf]  ;;  %v792_v1 = vld [vmem:[#allocation6 + $0x20] sm:$0xf0]  ;;  %v791_v2 = vld [vmem:[#allocation6 + $0x1c] sm:$0xf] }
  0x1d   :  { %v612_v4 = vld [vmem:[#allocation6 + $0x24] sm:$0xf0]  ;;  %v618_v5 = vld [vmem:[#allocation6 + $0x20] sm:$0xf]  ;;  %v793_v7 = vld [vmem:[#allocation6 + $0x28] sm:$0xf0] }
  0x1e   :  { %v615_v6 = vor.u32 %v791_v2, %v612_v4  ;;  %v619_v8 = vor.u32 %v793_v7, %v618_v5  ;;  %v598_v9 = vld [vmem:[#allocation6] sm:$0xf]  ;;  %v789_v10 = vld [vmem:[#allocation6 + $0x8] sm:$0xf0]  ;;  %v788_v11 = vld [vmem:[#allocation6 + $0x4] sm:$0xf] }
  0x1f   :  { %291 = vmatpush.bf16.msra.mxu0 %v647_v39  ;;  %v599_v12 = vor.u32 %v789_v10, %v598_v9  ;;  %v600_v13 = vld [vmem:[#allocation6 + $0xc] sm:$0xf0]  ;;  %v606_v14 = vld [vmem:[#allocation6 + $0x8] sm:$0xf]  ;;  %v790_v15 = vld [vmem:[#allocation6 + $0x10] sm:$0xf0] }
  0x20   :  { %304 = vmatpush.bf16.msra.mxu1 %v651_v43  ;;  %317 = vmatpush.bf16.msra.mxu2 %v655_v44  ;;  %v827_v20 = vld [vmem:[#allocation8 + $0x78] sm:$0xff]  ;;  %v818_v25 = vld [vmem:[#allocation8 + $0x30] sm:$0xff]  ;;  %v72_v28 = vand.u32 127, %v71_v21  ;;  %v817_v30 = vld [vmem:[#allocation8 + $0x28] sm:$0xff]  ;;  %s979_s7 = smov [#allocation9]   ;;  %s585_s11 = sshll.u32 %s1033_s4, 4  ;;  %s586_s11 = int_to_ptr.hbm [resolvable:$true] %s585_s11 }
  0x21   :  { %860 = vset.pattern.permute.xlu0 %v978_v17  ;;  %v835_v24 = vld [vmem:[#allocation8 + $0xb8] sm:$0xff]  ;;  %v826_v26 = vld [vmem:[#allocation8 + $0x70] sm:$0xff]  ;;  %539 = vmatpush.bf16.msra.mxu3 %v818_v25  ;;  %v825_v31 = vld [vmem:[#allocation8 + $0x68] sm:$0xff]  ;;  %s583_s8 = sshll.u32 %s979_s7, 4  ;;  %s584_s8 = int_to_ptr.vmem [resolvable:$true] %s583_s8 }
  0x22   :  { %858 = vset.pattern.permute.xlu1 %v977_v16  ;;  %v603_v16 = vor.u32 %v788_v11, %v600_v13  ;;  %v834_v27 = vld [vmem:[#allocation8 + $0xb0] sm:$0xff]  ;;  %v833_v32 = vld [vmem:[#allocation8 + $0xa8] sm:$0xff]  ;;  %v816_v35 = vld [vmem:[#allocation8 + $0x20] sm:$0xff] }
  0x23   :  { %112 = vperm.xlu1 %858, %v70_v3   ;;  %859 = vset.pattern.permute.xlu2 %v978_v17  ;;  %v607_v17 = vor.u32 %v790_v15, %v606_v14  ;;  %v824_v36 = vld [vmem:[#allocation8 + $0x60] sm:$0xff]  ;;  %v815_v42 = vld [vmem:[#allocation8 + $0x18] sm:$0xff]  ;;  %v814_v50 = vld [vmem:[#allocation8 + $0x10] sm:$0xff] }
  0x24   :  { %118 = vperm.xlu2 %859, %v70_v3   ;;  %292 = vmatpush.bf16.msra.mxu0 %v635_v48  ;;  %v611_v3 = vor.u32 %v792_v1, %v610_v63  ;;  %v832_v37 = vld [vmem:[#allocation8 + $0xa0] sm:$0xff]  ;;  %v823_v43 = vld [vmem:[#allocation8 + $0x58] sm:$0xff]  ;;  %v822_v51 = vld [vmem:[#allocation8 + $0x50] sm:$0xff] }
  0x25   :  { %305 = vmatpush.bf16.msra.mxu1 %v639_v52  ;;  %318 = vmatpush.bf16.msra.mxu2 %v643_v53  ;;  %v831_v45 = vld [vmem:[#allocation8 + $0x98] sm:$0xff]  ;;  %v830_v54 = vld [vmem:[#allocation8 + $0x90] sm:$0xff]  ;;  %v813_v59 = vld [vmem:[#allocation8 + $0x8] sm:$0xff] }
  0x26   :  { %540 = vmatpush.bf16.msra.mxu3 %v817_v30  ;;  %v821_v60 = vld [vmem:[#allocation8 + $0x48] sm:$0xff]  ;;  %v812_v2 = vld [vmem:[#allocation8] sm:$0xff]  ;;  %v861_v15 = vld [vmem:[%s1032_s3] ss:$0 sm:$0xff] }
  0x27   :  { %v829_v4 = vld [vmem:[#allocation8 + $0x88] sm:$0xff] }
  0x28   :  { %293 = vmatpush.bf16.msra.mxu0 %v623_v57 }
  0x29   :  { %306 = vmatpush.bf16.msra.mxu1 %v627_v61  ;;  %319 = vmatpush.bf16.msra.mxu2 %v631_v62 }
  0x2a   :  { %541 = vmatpush.bf16.msra.mxu3 %v816_v35 }
  0x2c   :  { %294 = vmatpush.bf16.msra.mxu0 %v611_v3  ;;  %v820_v3 = vld [vmem:[#allocation8 + $0x40] sm:$0xff] }
  0x2d   :  { %307 = vmatpush.bf16.msra.mxu1 %v615_v6  ;;  %320 = vmatpush.bf16.msra.mxu2 %v619_v8 }
  0x2e   :  { %542 = vmatpush.bf16.msra.mxu3 %v815_v42 }
  0x30   :  { %295 = vmatpush.bf16.msra.mxu0 %v599_v12 }
  0x31   :  { %308 = vmatpush.bf16.msra.mxu1 %v603_v16  ;;  %321 = vmatpush.bf16.msra.mxu2 %v607_v17 }
  0x32   :  { %543 = vmatpush.bf16.msra.mxu3 %v814_v50 }
  0x34   :  { %551 = vmatpush.bf16.msrb.mxu0 %v827_v20 }
  0x35   :  { %564 = vmatpush.bf16.msrb.mxu1 %v835_v24 }
  0x36   :  { %544 = vmatpush.bf16.msra.mxu3 %v813_v59 }
  0x38   :  { %552 = vmatpush.bf16.msrb.mxu0 %v826_v26 }
  0x39   :  { %565 = vmatpush.bf16.msrb.mxu1 %v834_v27 }
  0x3a   :  { %545 = vmatpush.bf16.msra.mxu3 %v812_v2 }
  0x3c   :  { %553 = vmatpush.bf16.msrb.mxu0 %v825_v31 }
  0x3d   :  { %566 = vmatpush.bf16.msrb.mxu1 %v833_v32 }
  0x40   :  { %554 = vmatpush.bf16.msrb.mxu0 %v824_v36 }
  0x41   :  { %567 = vmatpush.bf16.msrb.mxu1 %v832_v37 }
  0x44   :  { %555 = vmatpush.bf16.msrb.mxu0 %v823_v43 }
  0x45   :  { %568 = vmatpush.bf16.msrb.mxu1 %v831_v45 }
  0x48   :  { %556 = vmatpush.bf16.msrb.mxu0 %v822_v51 }
  0x49   :  { %569 = vmatpush.bf16.msrb.mxu1 %v830_v54 }
  0x4c   :  { %557 = vmatpush.bf16.msrb.mxu0 %v821_v60 }
  0x4d   :  { %570 = vmatpush.bf16.msrb.mxu1 %v829_v4 }
  0x50   :  { %558 = vmatpush.bf16.msrb.mxu0 %v820_v3 }
  0x6b   :  { %v101_v18 = vpop.permute.xlu2 %100 }
  0x6c   :  { %vm102_vm4 = vcmp.eq.s32.totalorder %v101_v18, %v72_v28 }
  0x6d   :  { %v103_v49 = vsel %vm102_vm4, 1, %v971_v0 }
  0x75   :  { %v107_v29 = vpop.permute.xlu2 %106 }
  0x76   :  { %vm108_vm5 = vcmp.eq.s32.totalorder %v107_v29, %v72_v28 }
  0x77   :  { %v109_v55 = vsel %vm108_vm5, 1, %v971_v0 }
  0x7e   :  { %v119_v47 = vpop.permute.xlu2 %118 }
  0x7f   :  { %vm120_vm6 = vcmp.eq.s32.totalorder %v119_v47, %v72_v28 }
  0x80   :  { %v121_v58 = vsel %vm120_vm6, 1, %v971_v0 }
  0x82   :  { %v78_v22 = vpop.permute.xlu0 %77 }
  0x83   :  { %v89_v23 = vpop.permute.xlu1 %88  ;;  %vm79_vm0 = vcmp.eq.s32.totalorder %v78_v22, %v72_v28 }
  0x84   :  { %vm90_vm1 = vcmp.eq.s32.totalorder %v89_v23, %v72_v28  ;;  %v80_v38 = vsel %vm79_vm0, 1, %v971_v0 }
  0x85   :  { %v91_v41 = vsel %vm90_vm1, 1, %v971_v0 }
  0x8b   :  { %v83_v33 = vpop.permute.xlu0 %82 }
  0x8c   :  { %v95_v34 = vpop.permute.xlu1 %94  ;;  %vm84_vm2 = vcmp.eq.s32.totalorder %v83_v33, %v72_v28 }
  0x8d   :  { %v85_v39 = vsel %vm84_vm2, 1, %v971_v0  ;;  %vm96_vm3 = vcmp.eq.s32.totalorder %v95_v34, %v72_v28 }
  0x8e   :  { %v86_v40 = vadd.s32 %v85_v39, %v80_v38  ;;  %v97_v46 = vsel %vm96_vm3, 1, %v971_v0 }
  0x90   :  { %v92_v44 = vadd.s32 %v91_v41, %v86_v40 }
  0x92   :  { %v98_v48 = vadd.s32 %v97_v46, %v92_v44 }
  0x94   :  { %v104_v52 = vadd.s32 %v103_v49, %v98_v48 }
  0x95   :  { %v113_v53 = vpop.permute.xlu1 %112 }
  0x96   :  { %vm114_vm7 = vcmp.eq.s32.totalorder %v113_v53, %v72_v28  ;;  %v110_v56 = vadd.s32 %v109_v55, %v104_v52 }
  0x97   :  { %v115_v57 = vsel %vm114_vm7, 1, %v971_v0  ;;  %v828_v0 = vld [vmem:[#allocation8 + $0x80] sm:$0xff] }
  0x98   :  { %v116_v61 = vadd.s32 %v115_v57, %v110_v56  ;;  %571 = vmatpush.bf16.msrb.mxu1 %v828_v0 }
  0x9a   :  { %v122_v62 = vadd.s32 %v121_v58, %v116_v61 }
  0x9c   :  { %v126_v63 = vcvt.s32.f32 %v122_v62 }
  0x9e   :  { %v127_v1 = vpack.c.bf16 %v126_v63, %v126_v63 }
  0xa0   :  { %296 = vmatmul.bf16.vlgmr.msra.gmra.mxu0 %v127_v1  ;;  %309 = vmatmul.bf16.vlgmr.msra.gmra.mxu1 %v127_v1 }
  0xa1   :  { %322 = vmatmul.bf16.vlgmr.msra.gmra.mxu2 %v127_v1 }
 0x11d   :  { %v297_v5 = vpop.f32.mrf.mxu0  ;;  %v310_v6 = vpop.f32.mrf.mxu1 }
 0x11e   :  { %v339_v7 = vpack.c.bf16 %v297_v5, %v297_v5  ;;  %v340_v8 = vpack.c.bf16 %v310_v6, %v310_v6 }
 0x120   :  { %546 = vmatmul.bf16.vlgmr.msra.gmra.mxu3 %v339_v7  ;;  %559 = vmatmul.bf16.vlgmr.msrb.gmra.mxu0 %v340_v8 }
 0x124   :  { %v323_v9 = vpop.f32.mrf.mxu2 }
 0x125   :  { %v341_v10 = vpack.c.bf16 %v323_v9, %v323_v9  ;;  %v299_v11 = vpop.f32.mrf.mxu0  ;;  %v312_v12 = vpop.f32.mrf.mxu1 }
 0x127   :  { %572 = vmatmul.bf16.vlgmr.msrb.gmra.mxu1 %v341_v10 }
 0x12c   :  { %v325_v13 = vpop.f32.mrf.mxu2 }
 0x19d   :  { %v560_v14 = vpop.f32.mrf.mxu0 }
 0x1a3   :  { %v547_v16 = vpop.f32.mrf.mxu3 }
 0x1a4   :  { %v548_v17 = vadd.f32 %v861_v15, %v547_v16  ;;  %v573_v18 = vpop.f32.mrf.mxu1 }
 0x1a5   :  { %v562_v19 = vpop.f32.mrf.mxu0 }
 0x1a6   :  { %v561_v20 = vadd.f32 %v560_v14, %v548_v17 }
 0x1a8   :  { %v574_v21 = vadd.f32 %v573_v18, %v561_v20 }
 0x1aa   :  { %577 = vst [vmem:[#allocation9] sm:$0xff] %v574_v21 }
 0x1ab   :  { %v549_v22 = vpop.f32.mrf.mxu3  ;;  %588 = dma.vmem_to_hbm [thread:$0]  %s584_s8, 128, %s586_s11, [#allocation5]  }
 0x1ac   :  { %v575_v23 = vpop.f32.mrf.mxu1 }
 0x1ad   :  { %962 = dma.done.wait [#allocation5], 128  }
 0x1ae   :  { %963 = vsyncadd [#allocation5], 4294967168 }
 0x1af   :  { %593 = vsyncpa [#allocation4], 1 }
 0x1b0   :  { %594 = vsyncpa [#allocation7], 1 }
 0x1b1   :  { %595 = vsyncpa [#allocation5], 1 }

// kernel: tpu_custom_call.1
= control target key start
LH: loop header
LB: loop body
LE: loop exit
PB: predicated region body
PF: predicated region fallthrough
CT: control target
= control target key end

     0   :  { %9 = vsyncpa [#allocation4], 0  ;;  %s1029_s0 = inlined_call_operand.hbm [shape: s32[8,8], index: 0, kind: input, shape index: {}]   ;;  %s1030_s1 = inlined_call_operand.hbm [shape: bf16[128,384], index: 1, kind: input, shape index: {}]   ;;  %s1031_s2 = inlined_call_operand.hbm [shape: bf16[384,128], index: 2, kind: input, shape index: {}]   ;;  %s1032_s3 = inlined_call_operand.vmem [shape: f32[1,128], index: 3, kind: input, shape index: {}]   ;;  %s1033_s4 = inlined_call_operand.hbm [shape: f32[8,128], index: 4, kind: output, shape index: {}]  }
   0x1   :  { %10 = vsyncpa [#allocation7], 0  ;;  %s27_s17 = sshll.u32 %s1030_s1, 4  ;;  %s28_s17 = int_to_ptr.hbm [resolvable:$true] %s27_s17 }
   0x2   :  { %11 = vsyncpa [#allocation5], 0  ;;  %s964_s18 = smov [#allocation6]   ;;  %s17_s22 = sshll.u32 %s1029_s0, 4  ;;  %s18_s22 = int_to_ptr.hbm [resolvable:$true] %s17_s22 }
   0x3   :  { %s29_s19 = sshll.u32 %s964_s18, 4  ;;  %s965_s23 = smov 192   ;;  %s30_s19 = int_to_ptr.vmem [resolvable:$true] %s29_s19 }
   0x4   :  { %s966_s24 = smov 12   ;;  %s967_s25 = smov [#allocation3]  }
   0x5   :  { %35 = dma.hbm_to_vmem [thread:$0]  %s28_s17, 3072, %s30_s19, [#allocation7], %s965_s23, %s965_s23, %s966_s24  }
   0x6   :  { %s19_s26 = sshll.u32 %s967_s25, 4  ;;  %s40_s29 = sshll.u32 %s1031_s2, 4  ;;  %s20_s26 = int_to_ptr.vmem [resolvable:$true] %s19_s26  ;;  %s41_s29 = int_to_ptr.hbm [resolvable:$true] %s40_s29 }
   0x7   :  { %22 = dma.hbm_to_vmem [thread:$0]  %s18_s22, 128, %s20_s26, [#allocation4]  }
   0x8   :  { %s968_s1 = smov [#allocation8]   ;;  %s969_s5 = smov 64  }
   0x9   :  { %s42_s30 = sshll.u32 %s968_s1, 4  ;;  %s970_s6 = smov 4   ;;  %s43_s30 = int_to_ptr.vmem [resolvable:$true] %s42_s30 }
   0xa   :  { %48 = dma.hbm_to_vmem [thread:$0]  %s41_s29, 3072, %s43_s30, [#allocation7], %s969_s5, %s969_s5, %s970_s6  }
   0xb   :  { %958 = dma.done.wait [#allocation4], 128  }
   0xc   :  { %959 = vsyncadd [#allocation4], 4294967168 }
   0xd   :  { %960 = dma.done.wait [#allocation7], 6144  }
   0xe   :  { %961 = vsyncadd [#allocation7], 4294961152  ;;  %v971_v0 = vmov 0   ;;  %v972_v1 = vmov 2   ;;  %v973_v2 = vmov 4   ;;  %v70_v3 = vld [vmem:[#allocation3] sm:$0xff] }
   0xf   :  { %852 = vset.pattern.permute.xlu0 %v971_v0  ;;  %854 = vset.pattern.permute.xlu1 %v972_v1  ;;  %v682_v4 = vld [vmem:[#allocation6 + $0xa8] sm:$0xf]  ;;  %v810_v5 = vld [vmem:[#allocation6 + $0xb0] sm:$0xf0]  ;;  %v809_v7 = vld [vmem:[#allocation6 + $0xac] sm:$0xf] }
  0x10   :  { %856 = vset.pattern.permute.xlu2 %v973_v2  ;;  %77 = vperm.xlu0 %852, %v70_v3   ;;  %v683_v6 = vor.u32 %v810_v5, %v682_v4  ;;  %v684_v8 = vld [vmem:[#allocation6 + $0xb4] sm:$0xf0]  ;;  %v690_v9 = vld [vmem:[#allocation6 + $0xb0] sm:$0xf]  ;;  %v811_v11 = vld [vmem:[#allocation6 + $0xb8] sm:$0xf0] }
  0x11   :  { %88 = vperm.xlu1 %854, %v70_v3   ;;  %100 = vperm.xlu2 %856, %v70_v3   ;;  %v687_v10 = vor.u32 %v809_v7, %v684_v8  ;;  %v691_v12 = vor.u32 %v811_v11, %v690_v9  ;;  %v974_v13 = vmov 1   ;;  %v975_v14 = vmov 3   ;;  %v670_v18 = vld [vmem:[#allocation6 + $0x90] sm:$0xf]  ;;  %v807_v19 = vld [vmem:[#allocation6 + $0x98] sm:$0xf0] }
  0x12   :  { %288 = vmatpush.bf16.msra.mxu0 %v683_v6  ;;  %v976_v15 = vmov 5   ;;  %v977_v16 = vmov 6   ;;  %v978_v17 = vmov 7   ;;  %v806_v20 = vld [vmem:[#allocation6 + $0x94] sm:$0xf]  ;;  %v671_v21 = vor.u32 %v807_v19, %v670_v18  ;;  %v819_v19 = vld [vmem:[#allocation8 + $0x38] sm:$0xff] }
  0x13   :  { %301 = vmatpush.bf16.msra.mxu1 %v687_v10  ;;  %314 = vmatpush.bf16.msra.mxu2 %v691_v12  ;;  %v672_v22 = vld [vmem:[#allocation6 + $0x9c] sm:$0xf0]  ;;  %v678_v23 = vld [vmem:[#allocation6 + $0x98] sm:$0xf]  ;;  %v808_v24 = vld [vmem:[#allocation6 + $0xa0] sm:$0xf0] }
  0x14   :  { %v675_v25 = vor.u32 %v806_v20, %v672_v22  ;;  %v679_v26 = vor.u32 %v808_v24, %v678_v23  ;;  %v658_v27 = vld [vmem:[#allocation6 + $0x78] sm:$0xf]  ;;  %v804_v28 = vld [vmem:[#allocation6 + $0x80] sm:$0xf0]  ;;  %v803_v29 = vld [vmem:[#allocation6 + $0x7c] sm:$0xf]  ;;  %538 = vmatpush.bf16.msra.mxu3 %v819_v19 }
  0x15   :  { %v659_v30 = vor.u32 %v804_v28, %v658_v27  ;;  %v660_v31 = vld [vmem:[#allocation6 + $0x84] sm:$0xf0]  ;;  %v666_v32 = vld [vmem:[#allocation6 + $0x80] sm:$0xf]  ;;  %v805_v33 = vld [vmem:[#allocation6 + $0x88] sm:$0xf0] }
  0x16   :  { %289 = vmatpush.bf16.msra.mxu0 %v671_v21  ;;  %v663_v34 = vor.u32 %v803_v29, %v660_v31  ;;  %v667_v35 = vor.u32 %v805_v33, %v666_v32  ;;  %v646_v36 = vld [vmem:[#allocation6 + $0x60] sm:$0xf]  ;;  %v801_v37 = vld [vmem:[#allocation6 + $0x68] sm:$0xf0]  ;;  %v800_v38 = vld [vmem:[#allocation6 + $0x64] sm:$0xf]  ;;  %v71_v21 = vlaneseq }
  0x17   :  { %302 = vmatpush.bf16.msra.mxu1 %v675_v25  ;;  %315 = vmatpush.bf16.msra.mxu2 %v679_v26  ;;  %v647_v39 = vor.u32 %v801_v37, %v646_v36  ;;  %v648_v40 = vld [vmem:[#allocation6 + $0x6c] sm:$0xf0]  ;;  %v654_v41 = vld [vmem:[#allocation6 + $0x68] sm:$0xf]  ;;  %v802_v42 = vld [vmem:[#allocation6 + $0x70] sm:$0xf0] }
  0x18   :  { %853 = vset.pattern.permute.xlu0 %v974_v13  ;;  %v651_v43 = vor.u32 %v800_v38, %v648_v40  ;;  %v655_v44 = vor.u32 %v802_v42, %v654_v41  ;;  %v634_v45 = vld [vmem:[#allocation6 + $0x48] sm:$0xf]  ;;  %v798_v46 = vld [vmem:[#allocation6 + $0x50] sm:$0xf0]  ;;  %v797_v47 = vld [vmem:[#allocation6 + $0x4c] sm:$0xf] }
  0x19   :  { %855 = vset.pattern.permute.xlu1 %v975_v14  ;;  %82 = vperm.xlu0 %853, %v70_v3   ;;  %v635_v48 = vor.u32 %v798_v46, %v634_v45  ;;  %v636_v49 = vld [vmem:[#allocation6 + $0x54] sm:$0xf0]  ;;  %v642_v50 = vld [vmem:[#allocation6 + $0x50] sm:$0xf]  ;;  %v799_v51 = vld [vmem:[#allocation6 + $0x58] sm:$0xf0] }
  0x1a   :  { %94 = vperm.xlu1 %855, %v70_v3   ;;  %857 = vset.pattern.permute.xlu2 %v976_v15  ;;  %v639_v52 = vor.u32 %v797_v47, %v636_v49  ;;  %v643_v53 = vor.u32 %v799_v51, %v642_v50  ;;  %v622_v54 = vld [vmem:[#allocation6 + $0x30] sm:$0xf]  ;;  %v795_v55 = vld [vmem:[#allocation6 + $0x38] sm:$0xf0]  ;;  %v794_v56 = vld [vmem:[#allocation6 + $0x34] sm:$0xf] }
  0x1b   :  { %106 = vperm.xlu2 %857, %v70_v3   ;;  %290 = vmatpush.bf16.msra.mxu0 %v659_v30  ;;  %v623_v57 = vor.u32 %v795_v55, %v622_v54  ;;  %v624_v58 = vld [vmem:[#allocation6 + $0x3c] sm:$0xf0]  ;;  %v630_v59 = vld [vmem:[#allocation6 + $0x38] sm:$0xf]  ;;  %v796_v60 = vld [vmem:[#allocation6 + $0x40] sm:$0xf0] }
  0x1c   :  { %303 = vmatpush.bf16.msra.mxu1 %v663_v34  ;;  %316 = vmatpush.bf16.msra.mxu2 %v667_v35  ;;  %v627_v61 = vor.u32 %v794_v56, %v624_v58  ;;  %v631_v62 = vor.u32 %v796_v60, %v630_v59  ;;  %v610_v63 = vld [vmem:[#allocation6 + $0x18] sm:$0xf]  ;;  %v792_v1 = vld [vmem:[#allocation6 + $0x20] sm:$0xf0]  ;;  %v791_v2 = vld [vmem:[#allocation6 + $0x1c] sm:$0xf] }
  0x1d   :  { %v612_v4 = vld [vmem:[#allocation6 + $0x24] sm:$0xf0]  ;;  %v618_v5 = vld [vmem:[#allocation6 + $0x20] sm:$0xf]  ;;  %v793_v7 = vld [vmem:[#allocation6 + $0x28] sm:$0xf0] }
  0x1e   :  { %v615_v6 = vor.u32 %v791_v2, %v612_v4  ;;  %v619_v8 = vor.u32 %v793_v7, %v618_v5  ;;  %v598_v9 = vld [vmem:[#allocation6] sm:$0xf]  ;;  %v789_v10 = vld [vmem:[#allocation6 + $0x8] sm:$0xf0]  ;;  %v788_v11 = vld [vmem:[#allocation6 + $0x4] sm:$0xf] }
  0x1f   :  { %291 = vmatpush.bf16.msra.mxu0 %v647_v39  ;;  %v599_v12 = vor.u32 %v789_v10, %v598_v9  ;;  %v600_v13 = vld [vmem:[#allocation6 + $0xc] sm:$0xf0]  ;;  %v606_v14 = vld [vmem:[#allocation6 + $0x8] sm:$0xf]  ;;  %v790_v15 = vld [vmem:[#allocation6 + $0x10] sm:$0xf0] }
  0x20   :  { %304 = vmatpush.bf16.msra.mxu1 %v651_v43  ;;  %317 = vmatpush.bf16.msra.mxu2 %v655_v44  ;;  %v827_v20 = vld [vmem:[#allocation8 + $0x78] sm:$0xff]  ;;  %v818_v25 = vld [vmem:[#allocation8 + $0x30] sm:$0xff]  ;;  %v72_v28 = vand.u32 127, %v71_v21  ;;  %v817_v30 = vld [vmem:[#allocation8 + $0x28] sm:$0xff]  ;;  %s979_s7 = smov [#allocation9]   ;;  %s585_s11 = sshll.u32 %s1033_s4, 4  ;;  %s586_s11 = int_to_ptr.hbm [resolvable:$true] %s585_s11 }
  0x21   :  { %860 = vset.pattern.permute.xlu0 %v978_v17  ;;  %v835_v24 = vld [vmem:[#allocation8 + $0xb8] sm:$0xff]  ;;  %v826_v26 = vld [vmem:[#allocation8 + $0x70] sm:$0xff]  ;;  %539 = vmatpush.bf16.msra.mxu3 %v818_v25  ;;  %v825_v31 = vld [vmem:[#allocation8 + $0x68] sm:$0xff]  ;;  %s583_s8 = sshll.u32 %s979_s7, 4  ;;  %s584_s8 = int_to_ptr.vmem [resolvable:$true] %s583_s8 }
  0x22   :  { %858 = vset.pattern.permute.xlu1 %v977_v16  ;;  %v603_v16 = vor.u32 %v788_v11, %v600_v13  ;;  %v834_v27 = vld [vmem:[#allocation8 + $0xb0] sm:$0xff]  ;;  %v833_v32 = vld [vmem:[#allocation8 + $0xa8] sm:$0xff]  ;;  %v816_v35 = vld [vmem:[#allocation8 + $0x20] sm:$0xff] }
  0x23   :  { %112 = vperm.xlu1 %858, %v70_v3   ;;  %859 = vset.pattern.permute.xlu2 %v978_v17  ;;  %v607_v17 = vor.u32 %v790_v15, %v606_v14  ;;  %v824_v36 = vld [vmem:[#allocation8 + $0x60] sm:$0xff]  ;;  %v815_v42 = vld [vmem:[#allocation8 + $0x18] sm:$0xff]  ;;  %v814_v50 = vld [vmem:[#allocation8 + $0x10] sm:$0xff] }
  0x24   :  { %118 = vperm.xlu2 %859, %v70_v3   ;;  %292 = vmatpush.bf16.msra.mxu0 %v635_v48  ;;  %v611_v3 = vor.u32 %v792_v1, %v610_v63  ;;  %v832_v37 = vld [vmem:[#allocation8 + $0xa0] sm:$0xff]  ;;  %v823_v43 = vld [vmem:[#allocation8 + $0x58] sm:$0xff]  ;;  %v822_v51 = vld [vmem:[#allocation8 + $0x50] sm:$0xff] }
  0x25   :  { %305 = vmatpush.bf16.msra.mxu1 %v639_v52  ;;  %318 = vmatpush.bf16.msra.mxu2 %v643_v53  ;;  %v831_v45 = vld [vmem:[#allocation8 + $0x98] sm:$0xff]  ;;  %v830_v54 = vld [vmem:[#allocation8 + $0x90] sm:$0xff]  ;;  %v813_v59 = vld [vmem:[#allocation8 + $0x8] sm:$0xff] }
  0x26   :  { %540 = vmatpush.bf16.msra.mxu3 %v817_v30  ;;  %v821_v60 = vld [vmem:[#allocation8 + $0x48] sm:$0xff]  ;;  %v812_v2 = vld [vmem:[#allocation8] sm:$0xff]  ;;  %v861_v15 = vld [vmem:[%s1032_s3] ss:$0 sm:$0xff] }
  0x27   :  { %v829_v4 = vld [vmem:[#allocation8 + $0x88] sm:$0xff] }
  0x28   :  { %293 = vmatpush.bf16.msra.mxu0 %v623_v57 }
  0x29   :  { %306 = vmatpush.bf16.msra.mxu1 %v627_v61  ;;  %319 = vmatpush.bf16.msra.mxu2 %v631_v62 }
  0x2a   :  { %541 = vmatpush.bf16.msra.mxu3 %v816_v35 }
  0x2c   :  { %294 = vmatpush.bf16.msra.mxu0 %v611_v3  ;;  %v820_v3 = vld [vmem:[#allocation8 + $0x40] sm:$0xff] }
  0x2d   :  { %307 = vmatpush.bf16.msra.mxu1 %v615_v6  ;;  %320 = vmatpush.bf16.msra.mxu2 %v619_v8 }
  0x2e   :  { %542 = vmatpush.bf16.msra.mxu3 %v815_v42 }
  0x30   :  { %295 = vmatpush.bf16.msra.mxu0 %v599_v12 }
  0x31   :  { %308 = vmatpush.bf16.msra.mxu1 %v603_v16  ;;  %321 = vmatpush.bf16.msra.mxu2 %v607_v17 }
  0x32   :  { %543 = vmatpush.bf16.msra.mxu3 %v814_v50 }
  0x34   :  { %551 = vmatpush.bf16.msrb.mxu0 %v827_v20 }
  0x35   :  { %564 = vmatpush.bf16.msrb.mxu1 %v835_v24 }
  0x36   :  { %544 = vmatpush.bf16.msra.mxu3 %v813_v59 }
  0x38   :  { %552 = vmatpush.bf16.msrb.mxu0 %v826_v26 }
  0x39   :  { %565 = vmatpush.bf16.msrb.mxu1 %v834_v27 }
  0x3a   :  { %545 = vmatpush.bf16.msra.mxu3 %v812_v2 }
  0x3c   :  { %553 = vmatpush.bf16.msrb.mxu0 %v825_v31 }
  0x3d   :  { %566 = vmatpush.bf16.msrb.mxu1 %v833_v32 }
  0x40   :  { %554 = vmatpush.bf16.msrb.mxu0 %v824_v36 }
  0x41   :  { %567 = vmatpush.bf16.msrb.mxu1 %v832_v37 }
  0x44   :  { %555 = vmatpush.bf16.msrb.mxu0 %v823_v43 }
  0x45   :  { %568 = vmatpush.bf16.msrb.mxu1 %v831_v45 }
  0x48   :  { %556 = vmatpush.bf16.msrb.mxu0 %v822_v51 }
  0x49   :  { %569 = vmatpush.bf16.msrb.mxu1 %v830_v54 }
  0x4c   :  { %557 = vmatpush.bf16.msrb.mxu0 %v821_v60 }
  0x4d   :  { %570 = vmatpush.bf16.msrb.mxu1 %v829_v4 }
  0x50   :  { %558 = vmatpush.bf16.msrb.mxu0 %v820_v3 }
  0x6b   :  { %v101_v18 = vpop.permute.xlu2 %100 }
  0x6c   :  { %vm102_vm4 = vcmp.eq.s32.totalorder %v101_v18, %v72_v28 }
  0x6d   :  { %v103_v49 = vsel %vm102_vm4, 1, %v971_v0 }
  0x75   :  { %v107_v29 = vpop.permute.xlu2 %106 }
  0x76   :  { %vm108_vm5 = vcmp.eq.s32.totalorder %v107_v29, %v72_v28 }
  0x77   :  { %v109_v55 = vsel %vm108_vm5, 1, %v971_v0 }
  0x7e   :  { %v119_v47 = vpop.permute.xlu2 %118 }
  0x7f   :  { %vm120_vm6 = vcmp.eq.s32.totalorder %v119_v47, %v72_v28 }
  0x80   :  { %v121_v58 = vsel %vm120_vm6, 1, %v971_v0 }
  0x82   :  { %v78_v22 = vpop.permute.xlu0 %77 }
  0x83   :  { %v89_v23 = vpop.permute.xlu1 %88  ;;  %vm79_vm0 = vcmp.eq.s32.totalorder %v78_v22, %v72_v28 }
  0x84   :  { %vm90_vm1 = vcmp.eq.s32.totalorder %v89_v23, %v72_v28  ;;  %v80_v38 = vsel %vm79_vm0, 1, %v971_v0 }
  0x85   :  { %v91_v41 = vsel %vm90_vm1, 1, %v971_v0 }
  0x8b   :  { %v83_v33 = vpop.permute.xlu0 %82 }
  0x8c   :  { %v95_v34 = vpop.permute.xlu1 %94  ;;  %vm84_vm2 = vcmp.eq.s32.totalorder %v83_v33, %v72_v28 }
  0x8d   :  { %v85_v39 = vsel %vm84_vm2, 1, %v971_v0  ;;  %vm96_vm3 = vcmp.eq.s32.totalorder %v95_v34, %v72_v28 }
  0x8e   :  { %v86_v40 = vadd.s32 %v85_v39, %v80_v38  ;;  %v97_v46 = vsel %vm96_vm3, 1, %v971_v0 }
  0x90   :  { %v92_v44 = vadd.s32 %v91_v41, %v86_v40 }
  0x92   :  { %v98_v48 = vadd.s32 %v97_v46, %v92_v44 }
  0x94   :  { %v104_v52 = vadd.s32 %v103_v49, %v98_v48 }
  0x95   :  { %v113_v53 = vpop.permute.xlu1 %112 }
  0x96   :  { %vm114_vm7 = vcmp.eq.s32.totalorder %v113_v53, %v72_v28  ;;  %v110_v56 = vadd.s32 %v109_v55, %v104_v52 }
  0x97   :  { %v115_v57 = vsel %vm114_vm7, 1, %v971_v0  ;;  %v828_v0 = vld [vmem:[#allocation8 + $0x80] sm:$0xff] }
  0x98   :  { %v116_v61 = vadd.s32 %v115_v57, %v110_v56  ;;  %571 = vmatpush.bf16.msrb.mxu1 %v828_v0 }
  0x9a   :  { %v122_v62 = vadd.s32 %v121_v58, %v116_v61 }
  0x9c   :  { %v126_v63 = vcvt.s32.f32 %v122_v62 }
  0x9e   :  { %v127_v1 = vpack.c.bf16 %v126_v63, %v126_v63 }
  0xa0   :  { %296 = vmatmul.bf16.vlgmr.msra.gmra.mxu0 %v127_v1  ;;  %309 = vmatmul.bf16.vlgmr.msra.gmra.mxu1 %v127_v1 }
  0xa1   :  { %322 = vmatmul.bf16.vlgmr.msra.gmra.mxu2 %v127_v1 }
 0x11d   :  { %v297_v5 = vpop.f32.mrf.mxu0  ;;  %v310_v6 = vpop.f32.mrf.mxu1 }
 0x11e   :  { %v339_v7 = vpack.c.bf16 %v297_v5, %v297_v5  ;;  %v340_v8 = vpack.c.bf16 %v310_v6, %v310_v6 }
 0x120   :  { %546 = vmatmul.bf16.vlgmr.msra.gmra.mxu3 %v339_v7  ;;  %559 = vmatmul.bf16.vlgmr.msrb.gmra.mxu0 %v340_v8 }
 0x124   :  { %v323_v9 = vpop.f32.mrf.mxu2 }
 0x125   :  { %v341_v10 = vpack.c.bf16 %v323_v9, %v323_v9  ;;  %v299_v11 = vpop.f32.mrf.mxu0  ;;  %v312_v12 = vpop.f32.mrf.mxu1 }
 0x127   :  { %572 = vmatmul.bf16.vlgmr.msrb.gmra.mxu1 %v341_v10 }
 0x12c   :  { %v325_v13 = vpop.f32.mrf.mxu2 }
 0x19d   :  { %v560_v14 = vpop.f32.mrf.mxu0 }
 0x1a3   :  { %v547_v16 = vpop.f32.mrf.mxu3 }
 0x1a4   :  { %v548_v17 = vadd.f32 %v861_v15, %v547_v16  ;;  %v573_v18 = vpop.f32.mrf.mxu1 }
 0x1a5   :  { %v562_v19 = vpop.f32.mrf.mxu0 }
 0x1a6   :  { %v561_v20 = vadd.f32 %v560_v14, %v548_v17 }
 0x1a8   :  { %v574_v21 = vadd.f32 %v573_v18, %v561_v20 }
 0x1aa   :  { %577 = vst [vmem:[#allocation9] sm:$0xff] %v574_v21 }
 0x1ab   :  { %v549_v22 = vpop.f32.mrf.mxu3  ;;  %588 = dma.vmem_to_hbm [thread:$0]  %s584_s8, 128, %s586_s11, [#allocation5]  }
 0x1ac   :  { %v575_v23 = vpop.f32.mrf.mxu1 }
 0x1ad   :  { %962 = dma.done.wait [#allocation5], 128  }
 0x1ae   :  { %963 = vsyncadd [#allocation5], 4294967168 }
 0x1af   :  { %593 = vsyncpa [#allocation4], 1 }
 0x1b0   :  { %594 = vsyncpa [#allocation7], 1 }
 0x1b1   :  { %595 = vsyncpa [#allocation5], 1 }

</bundles_post_ra>
